<compile_context>
chip_gen: v6e
topology: v6e:2x2x1
jax: 0.10.0
libtpu: 0.0.40
codegen_flags: <defaults>
</compile_context>

<pallas_src>
import jax
import jax.numpy as jnp
from jax.experimental import pallas as pl
from jax.experimental.pallas import tpu as pltpu


# -----------------------------------------------------------------------------
# Fused kernel: gumbel-softmax selection + feature selection + MLP head
# -----------------------------------------------------------------------------
def _fused_kernel(inv_temp_ref, logits_ref, gumbel_ref,
                  w1_ref, b1_ref, w2_ref, b2_ref,
                  x_ref, out_ref):
    # inv_temp_ref : SMEM (1, 1) f32        (resident scalar)
    # logits_ref   : VMEM (D, K) f32        (resident)
    # gumbel_ref   : VMEM (D, K) f32        (resident)
    # w1_ref       : VMEM (K, H) bf16       (resident)
    # b1_ref       : VMEM (1, H) f32        (resident)
    # w2_ref       : VMEM (H, O) bf16       (resident)
    # b2_ref       : VMEM (1, O) f32        (resident)
    # x_ref        : VMEM (TB, D) f32       (tiled over batch, pipelined DMA)
    # out_ref      : VMEM (TB, O) f32

    # --- gumbel-softmax over axis 0 (input_dim).  Tiny (D,K) block; recomputed
    #     per grid step (1-2 steps total) — far cheaper than a second dispatch.
    z = (logits_ref[...] + gumbel_ref[...]) * inv_temp_ref[0, 0]      # f32
    z = z - jnp.max(z, axis=0, keepdims=True)
    e = jnp.exp(z)
    y = e * pl.reciprocal(jnp.sum(e, axis=0, keepdims=True), approx=True)

    # --- algebraic fusion: (x @ y) @ W1 == x @ (y @ W1); yw1 is (D, H).
    yw1 = jnp.dot(y.astype(jnp.bfloat16), w1_ref[...],
                  preferred_element_type=jnp.float32)

    # --- batched head: bf16 MXU operands, f32 accumulation.
    h = jnp.dot(x_ref[...].astype(jnp.bfloat16), yw1.astype(jnp.bfloat16),
                preferred_element_type=jnp.float32) + b1_ref[...]
    h = jnp.maximum(h, 0.0)
    # O < 128 lanes -> masked partial stores; store volume is tiny, acceptable.
    out = jnp.dot(h.astype(jnp.bfloat16), w2_ref[...],
                  preferred_element_type=jnp.float32) + b2_ref[...]
    out_ref[...] = out.astype(out_ref.dtype)


# -----------------------------------------------------------------------------
# Tiling policy
# -----------------------------------------------------------------------------
def _num_tensorcores():
    """Best-effort TensorCores-per-device detection (dual-TC megacore chips)."""
    try:
        kind = jax.devices()[0].device_kind.lower()
    except Exception:
        return 1
    for tag in ("v4", "v5p", "v7", "7x"):
        if tag in kind:
            return 2
    return 1


def _pick_tile_b(batch, num_cores, max_tile=8192):
    """Largest batch tile such that:
      * the grid step count is a multiple of num_cores (every TC gets work),
      * non-full tiles are sublane-aligned (multiple of 8),
      * the tile stays under max_tile rows (keeps VMEM trivial even on v7x).
    Single-TC chips get one grid step — per-step overhead (~0.35 us) dominates
    at these shapes, so extra steps are pure cost."""
    if num_cores <= 1 and batch <= max_tile:
        return batch
    for steps in range(num_cores, batch + 1, max(num_cores, 1)):
        if batch % steps:
            continue
        tile = batch // steps
        if tile <= max_tile and (tile % 8 == 0 or tile == batch):
            return tile
    return batch  # ragged / tiny batch: single whole-array block


# -----------------------------------------------------------------------------
# One-time parameter prep (hoisted casts / reshapes)
# -----------------------------------------------------------------------------
def prepare_params(logit_scale, temperature, w1, b1, w2, b2):
    hidden = w1.shape[1]
    out_dim = w2.shape[1]
    return dict(
        inv_temp=jnp.reshape(1.0 / jnp.asarray(temperature, jnp.float32), (1, 1)),
        logit_scale=jnp.asarray(logit_scale, jnp.float32),
        w1=jnp.asarray(w1, jnp.bfloat16),
        b1=jnp.reshape(jnp.asarray(b1, jnp.float32), (1, hidden)),
        w2=jnp.asarray(w2, jnp.bfloat16),
        b2=jnp.reshape(jnp.asarray(b2, jnp.float32), (1, out_dim)),
    )


# -----------------------------------------------------------------------------
# Forward
# -----------------------------------------------------------------------------
@jax.jit
def concrete_classifier_forward(x, gumbel, params):
    inv_temp = params["inv_temp"]
    logit_scale = params["logit_scale"]
    w1, b1, w2, b2 = params["w1"], params["b1"], params["w2"], params["b2"]

    B, D = x.shape
    Dk, K = logit_scale.shape
    assert D == Dk
    K2, H = w1.shape
    assert K2 == K
    H2, O = w2.shape
    assert H2 == H

    tile_b = _pick_tile_b(B, _num_tensorcores())
    grid = (B // tile_b,)

    resident = lambda shape: pl.BlockSpec(shape, lambda i: tuple(0 for _ in shape))

    out = pl.pallas_call(
        _fused_kernel,
        out_shape=jax.ShapeDtypeStruct((B, O), jnp.float32),
        grid=grid,
        in_specs=[
            pl.BlockSpec(memory_space=pltpu.SMEM),        # inv_temp scalar
            resident((D, K)),                             # logit_scale
            resident((D, K)),                             # gumbel noise
            resident((K, H)),                             # w1
            resident((1, H)),                             # b1
            resident((H, O)),                             # w2
            resident((1, O)),                             # b2
            pl.BlockSpec((tile_b, D), lambda i: (i, 0)),  # x tile (f32, pipelined)
        ],
        out_specs=pl.BlockSpec((tile_b, O), lambda i: (i, 0)),
        compiler_params=pltpu.CompilerParams(
            dimension_semantics=("parallel",),            # megacore sharding
        ),
    )(inv_temp, logit_scale, gumbel, w1, b1, w2, b2, x)
    return out


# -----------------------------------------------------------------------------
# References
# -----------------------------------------------------------------------------
def _reference_f32(x, logit_scale, gumbel, temperature, w1, b1, w2, b2):
    z = (logit_scale + gumbel) / temperature
    y = jax.nn.softmax(z, axis=0)
    h = x @ y
    h = jnp.maximum(h @ w1 + b1, 0.0)
    return h @ w2 + b2


def _reference_bf16(x, logit_scale, gumbel, temperature, w1, b1, w2, b2):
    # Same bf16-operand / f32-accumulate / fused (y @ w1) scheme as the kernel.
    z = (logit_scale + gumbel) * (1.0 / temperature)
    y = jax.nn.softmax(z, axis=0).astype(jnp.bfloat16)
    yw1 = jnp.dot(y, w1.astype(jnp.bfloat16), preferred_element_type=jnp.float32)
    h = jnp.dot(x.astype(jnp.bfloat16), yw1.astype(jnp.bfloat16),
                preferred_element_type=jnp.float32) + b1
    h = jnp.maximum(h, 0.0)
    return jnp.dot(h.astype(jnp.bfloat16), w2.astype(jnp.bfloat16),
                   preferred_element_type=jnp.float32) + b2


if __name__ == "__main__":
    # Shapes consistent with the module: input_dim=32, k_feature_select=8,
    # hidden_dim_cls=32, output_dim=4.  Batch=256 so dual-TC chips get 2 grid
    # steps (128-row tiles) while single-TC chips collapse to one step.
    B, D, K, H, O = 256, 32, 8, 32, 4
    initial_temperature = 1.0

    key = jax.random.PRNGKey(0)
    kx, klog, ku, kw1, kb1, kw2, kb2 = jax.random.split(key, 7)

    x = jax.random.normal(kx, (B, D), dtype=jnp.float32)

    # ConcreteLayer parameters (torch.randn init -> standard normal).
    logit_scale = jax.random.normal(klog, (D, K), dtype=jnp.float32)

    # Gumbel noise sampled in plain JAX (kept outside the kernel so the run is
    # deterministic and directly comparable to the reference).
    u = jax.random.uniform(ku, (D, K), dtype=jnp.float32)
    gumbel = -jnp.log(-jnp.log(u + 1e-10) + 1e-10)

    # MLP parameters (nn.Linear-style uniform init).
    lim1 = 1.0 / jnp.sqrt(K)
    w1 = jax.random.uniform(kw1, (K, H), minval=-lim1, maxval=lim1, dtype=jnp.float32)
    b1 = jax.random.uniform(kb1, (H,), minval=-lim1, maxval=lim1, dtype=jnp.float32)
    lim2 = 1.0 / jnp.sqrt(H)
    w2 = jax.random.uniform(kw2, (H, O), minval=-lim2, maxval=lim2, dtype=jnp.float32)
    b2 = jax.random.uniform(kb2, (O,), minval=-lim2, maxval=lim2, dtype=jnp.float32)

    temperature = jnp.float32(initial_temperature)

    # One-time parameter prep (hoisted casts / reshapes).
    params = prepare_params(logit_scale, temperature, w1, b1, w2, b2)

    out = concrete_classifier_forward(x, gumbel, params)
    out = jax.block_until_ready(out)
    assert out.shape == (B, O)

    # Tight check against a reference using the same bf16-operand scheme.
    ref_bf16 = _reference_bf16(x, logit_scale, gumbel, temperature, w1, b1, w2, b2)
    assert jnp.allclose(out, ref_bf16, atol=3e-2, rtol=3e-2), (
        "mismatch vs bf16-matched reference: max |diff| = "
        f"{float(jnp.max(jnp.abs(out - ref_bf16)))}")

    # Looser check against the full-f32 module semantics (bf16 rounding).
    ref_f32 = _reference_f32(x, logit_scale, gumbel, temperature, w1, b1, w2, b2)
    assert jnp.allclose(out, ref_f32, atol=8e-2, rtol=8e-2), (
        "mismatch vs f32 reference: max |diff| = "
        f"{float(jnp.max(jnp.abs(out - ref_f32)))}")

    print("KERNEL_OK")
</pallas_src>

<mosaic_0001>
module attributes {stable_mosaic.version = 11 : i64} {
  func.func @_fused_kernel(%arg0: i32, %arg1: memref<1x1xf32, #tpu.memory_space<smem>>, %arg2: memref<32x8xf32, #tpu.memory_space<vmem>>, %arg3: memref<32x8xf32, #tpu.memory_space<vmem>>, %arg4: memref<8x32xbf16, #tpu.memory_space<vmem>>, %arg5: memref<1x32xf32, #tpu.memory_space<vmem>>, %arg6: memref<32x4xbf16, #tpu.memory_space<vmem>>, %arg7: memref<1x4xf32, #tpu.memory_space<vmem>>, %arg8: memref<256x32xf32, #tpu.memory_space<vmem>>, %arg9: memref<256x4xf32, #tpu.memory_space<vmem>>) attributes {dimension_semantics = [#tpu.dimension_semantics<parallel>], iteration_bounds = array<i64: 1>, scalar_prefetch = 0 : i64, scratch_operands = 0 : i64, tpu.core_type = #tpu.core_type<tc>, window_params = [{transform_indices = @transform_0, window_bounds = array<i64: 1, 1>}, {pipeline_mode = #tpu.pipeline_mode<synchronous>, transform_indices = @transform_1, window_bounds = array<i64: 32, 8>}, {pipeline_mode = #tpu.pipeline_mode<synchronous>, transform_indices = @transform_2, window_bounds = array<i64: 32, 8>}, {pipeline_mode = #tpu.pipeline_mode<synchronous>, transform_indices = @transform_3, window_bounds = array<i64: 8, 32>}, {pipeline_mode = #tpu.pipeline_mode<synchronous>, transform_indices = @transform_4, window_bounds = array<i64: 1, 32>}, {pipeline_mode = #tpu.pipeline_mode<synchronous>, transform_indices = @transform_5, window_bounds = array<i64: 32, 4>}, {pipeline_mode = #tpu.pipeline_mode<synchronous>, transform_indices = @transform_6, window_bounds = array<i64: 1, 4>}, {transform_indices = @transform_7, window_bounds = array<i64: 256, 32>}, {transform_indices = @transform_8, window_bounds = array<i64: 256, 4>}]} {
    %c0 = arith.constant 0 : index
    %c0_0 = arith.constant 0 : index
    %0 = vector.load %arg2[%c0, %c0_0] : memref<32x8xf32, #tpu.memory_space<vmem>>, vector<32x8xf32>
    %c0_1 = arith.constant 0 : index
    %c0_2 = arith.constant 0 : index
    %1 = vector.load %arg3[%c0_1, %c0_2] : memref<32x8xf32, #tpu.memory_space<vmem>>, vector<32x8xf32>
    %2 = arith.addf %0, %1 : vector<32x8xf32>
    %c0_3 = arith.constant 0 : index
    %c0_4 = arith.constant 0 : index
    %3 = memref.load %arg1[%c0_3, %c0_4] : memref<1x1xf32, #tpu.memory_space<smem>>
    %4 = vector.broadcast %3 : f32 to vector<32x8xf32>
    %5 = arith.mulf %2, %4 : vector<32x8xf32>
    %cst = arith.constant dense<0xFF800000> : vector<8xf32>
    %6 = vector.multi_reduction <maximumf>, %5, %cst [0] : vector<32x8xf32> to vector<8xf32>
    %7 = vector.shape_cast %6 : vector<8xf32> to vector<1x8xf32>
    %8 = vector.broadcast %7 : vector<1x8xf32> to vector<32x8xf32>
    %9 = arith.subf %5, %8 : vector<32x8xf32>
    %10 = math.exp %9 : vector<32x8xf32>
    %cst_5 = arith.constant dense<0.000000e+00> : vector<8xf32>
    %11 = vector.multi_reduction <add>, %10, %cst_5 [0] : vector<32x8xf32> to vector<8xf32>
    %12 = vector.shape_cast %11 : vector<8xf32> to vector<1x8xf32>
    %13 = tpu.reciprocal %12 {approx = true} : vector<1x8xf32> -> vector<1x8xf32>
    %14 = vector.broadcast %13 : vector<1x8xf32> to vector<32x8xf32>
    %15 = arith.mulf %10, %14 : vector<32x8xf32>
    %16 = arith.truncf %15 : vector<32x8xf32> to vector<32x8xbf16>
    %c0_6 = arith.constant 0 : index
    %c0_7 = arith.constant 0 : index
    %17 = vector.load %arg4[%c0_6, %c0_7] : memref<8x32xbf16, #tpu.memory_space<vmem>>, vector<8x32xbf16>
    %cst_8 = arith.constant dense<0.000000e+00> : vector<32x32xf32>
    %18 = tpu.matmul %16, %17, %cst_8 {dimension_numbers = #tpu.dot_dimension_numbers<[1], [0], [0], [1], [0, 0, 1, 1], [], []>} : vector<32x8xbf16>, vector<8x32xbf16>, vector<32x32xf32> -> vector<32x32xf32>
    %c0_9 = arith.constant 0 : index
    %c0_10 = arith.constant 0 : index
    %19 = vector.load %arg8[%c0_9, %c0_10] : memref<256x32xf32, #tpu.memory_space<vmem>>, vector<256x32xf32>
    %20 = arith.truncf %19 : vector<256x32xf32> to vector<256x32xbf16>
    %21 = arith.truncf %18 : vector<32x32xf32> to vector<32x32xbf16>
    %cst_11 = arith.constant dense<0.000000e+00> : vector<256x32xf32>
    %22 = tpu.matmul %20, %21, %cst_11 {dimension_numbers = #tpu.dot_dimension_numbers<[1], [0], [0], [1], [0, 0, 1, 1], [], []>} : vector<256x32xbf16>, vector<32x32xbf16>, vector<256x32xf32> -> vector<256x32xf32>
    %c0_12 = arith.constant 0 : index
    %c0_13 = arith.constant 0 : index
    %23 = vector.load %arg5[%c0_12, %c0_13] : memref<1x32xf32, #tpu.memory_space<vmem>>, vector<1x32xf32>
    %24 = vector.broadcast %23 : vector<1x32xf32> to vector<256x32xf32>
    %25 = arith.addf %22, %24 : vector<256x32xf32>
    %cst_14 = arith.constant 0.000000e+00 : f32
    %26 = vector.broadcast %cst_14 : f32 to vector<256x32xf32>
    %27 = arith.maximumf %25, %26 : vector<256x32xf32>
    %28 = arith.truncf %27 : vector<256x32xf32> to vector<256x32xbf16>
    %c0_15 = arith.constant 0 : index
    %c0_16 = arith.constant 0 : index
    %29 = vector.load %arg6[%c0_15, %c0_16] : memref<32x4xbf16, #tpu.memory_space<vmem>>, vector<32x4xbf16>
    %cst_17 = arith.constant dense<0.000000e+00> : vector<256x4xf32>
    %30 = tpu.matmul %28, %29, %cst_17 {dimension_numbers = #tpu.dot_dimension_numbers<[1], [0], [0], [1], [0, 0, 1, 1], [], []>} : vector<256x32xbf16>, vector<32x4xbf16>, vector<256x4xf32> -> vector<256x4xf32>
    %c0_18 = arith.constant 0 : index
    %c0_19 = arith.constant 0 : index
    %31 = vector.load %arg7[%c0_18, %c0_19] : memref<1x4xf32, #tpu.memory_space<vmem>>, vector<1x4xf32>
    %32 = vector.broadcast %31 : vector<1x4xf32> to vector<256x4xf32>
    %33 = arith.addf %30, %32 : vector<256x4xf32>
    %c0_20 = arith.constant 0 : index
    %c0_21 = arith.constant 0 : index
    %34 = vector.load %arg9[%c0_20, %c0_21] : memref<256x4xf32, #tpu.memory_space<vmem>>, vector<256x4xf32>
    tpu.vector_store %arg9[%c0_20, %c0_21], %33 {strides = array<i32>} : memref<256x4xf32, #tpu.memory_space<vmem>>, vector<256x4xf32>,
    return
  }
  func.func @transform_0(%arg0: i32) -> (i32, i32) {
    %c0_i32 = arith.constant 0 : i32
    %c0_i32_0 = arith.constant 0 : i32
    %c0_i32_1 = arith.constant 0 : i32
    return %c0_i32, %c0_i32_0 : i32, i32
  }
  func.func @transform_1(%arg0: i32) -> (i32, i32) {
    %c0_i32 = arith.constant 0 : i32
    %c0_i32_0 = arith.constant 0 : i32
    %c0_i32_1 = arith.constant 0 : i32
    return %c0_i32, %c0_i32_0 : i32, i32
  }
  func.func @transform_2(%arg0: i32) -> (i32, i32) {
    %c0_i32 = arith.constant 0 : i32
    %c0_i32_0 = arith.constant 0 : i32
    %c0_i32_1 = arith.constant 0 : i32
    return %c0_i32, %c0_i32_0 : i32, i32
  }
  func.func @transform_3(%arg0: i32) -> (i32, i32) {
    %c0_i32 = arith.constant 0 : i32
    %c0_i32_0 = arith.constant 0 : i32
    %c0_i32_1 = arith.constant 0 : i32
    return %c0_i32, %c0_i32_0 : i32, i32
  }
  func.func @transform_4(%arg0: i32) -> (i32, i32) {
    %c0_i32 = arith.constant 0 : i32
    %c0_i32_0 = arith.constant 0 : i32
    %c0_i32_1 = arith.constant 0 : i32
    return %c0_i32, %c0_i32_0 : i32, i32
  }
  func.func @transform_5(%arg0: i32) -> (i32, i32) {
    %c0_i32 = arith.constant 0 : i32
    %c0_i32_0 = arith.constant 0 : i32
    %c0_i32_1 = arith.constant 0 : i32
    return %c0_i32, %c0_i32_0 : i32, i32
  }
  func.func @transform_6(%arg0: i32) -> (i32, i32) {
    %c0_i32 = arith.constant 0 : i32
    %c0_i32_0 = arith.constant 0 : i32
    %c0_i32_1 = arith.constant 0 : i32
    return %c0_i32, %c0_i32_0 : i32, i32
  }
  func.func @transform_7(%arg0: i32) -> (i32, i32) {
    %c0_i32 = arith.constant 0 : i32
    %c0_i32_0 = arith.constant 0 : i32
    return %arg0, %c0_i32 : i32, i32
  }
  func.func @transform_8(%arg0: i32) -> (i32, i32) {
    %c0_i32 = arith.constant 0 : i32
    %c0_i32_0 = arith.constant 0 : i32
    return %arg0, %c0_i32 : i32, i32
  }
}

</mosaic_0001>

<bundles_post_ra>
// kernel: concrete_classifier_forward.1
= control target key start
LH: loop header
LB: loop body
LE: loop exit
PB: predicated region body
PF: predicated region fallthrough
CT: control target
= control target key end

     0   :  { %vm102_vm0 = vcmask 1043456   ;;  %vm49_vm1 = vcmask 64512   ;;  %vm212_vm2 = vcmask 261120   ;;  %vm702_vm3 = vcmask 31744   ;;  %s1328_s3 = inlined_call_operand.vmem [shape: bf16[8,32], index: 3, kind: input, shape index: {}]   ;;  %s1329_s0 = inlined_call_operand.<no memory space> [shape: f32[1,1], index: 0, kind: input, shape index: {}]   ;;  %s1330_s1 = inlined_call_operand.vmem [shape: f32[32,8], index: 1, kind: input, shape index: {}]   ;;  %s1331_s2 = inlined_call_operand.vmem [shape: f32[32,8], index: 2, kind: input, shape index: {}]   ;;  %s1332_s7 = inlined_call_operand.vmem [shape: f32[256,32], index: 7, kind: input, shape index: {}]   ;;  %s1333_s5 = inlined_call_operand.vmem [shape: bf16[32,4], index: 5, kind: input, shape index: {}]   ;;  %s1334_s4 = inlined_call_operand.vmem [shape: f32[1,32], index: 4, kind: input, shape index: {}]   ;;  %s1335_s6 = inlined_call_operand.vmem [shape: f32[1,4], index: 6, kind: input, shape index: {}]   ;;  %s1336_s8 = inlined_call_operand.vmem [shape: f32[256,4], index: 8, kind: output, shape index: {}]  }
   0x1   :  { %v95_v0 = vld [vmem:[%s1328_s3] sm:$0xf]  ;;  %v32_v2 = vld [vmem:[%s1330_s1 + $0x8] sm:$0xff]  ;;  %v33_v4 = vld [vmem:[%s1330_s1 + $0x10] sm:$0xff]  ;;  %v44_v7 = vstv %s1329_s0 }
   0x2   :  { %v31_v1 = vld [vmem:[%s1330_s1] sm:$0xff]  ;;  %894 = vmatprep.subr.msk.bf16.mxu0 %vm102_vm0, %v95_v0  ;;  %v104_v3 = vsel %vm102_vm0, %v95_v0, 0  ;;  %v34_v5 = vld [vmem:[%s1330_s1 + $0x18] sm:$0xff]  ;;  %v36_v8 = vld [vmem:[%s1331_s2 + $0x8] sm:$0xff] }
   0x3   :  { %v35_v6 = vld [vmem:[%s1331_s2] sm:$0xff]  ;;  %817 = vmatpush3.bf16.msra.mxu0 %v104_v3  ;;  %v37_v9 = vld [vmem:[%s1331_s2 + $0x10] sm:$0xff]  ;;  %v38_v10 = vld [vmem:[%s1331_s2 + $0x18] sm:$0xff]  ;;  %v40_v12 = vadd.f32 %v36_v8, %v32_v2 }
   0x4   :  { %v39_v11 = vadd.f32 %v35_v6, %v31_v1  ;;  %v41_v13 = vadd.f32 %v37_v9, %v33_v4  ;;  %v42_v14 = vadd.f32 %v38_v10, %v34_v5  ;;  %v155_v0 = vld [vmem:[%s1332_s7] sm:$0xff]  ;;  %v156_v1 = vld [vmem:[%s1332_s7 + $0x8] sm:$0xff]  ;;  %v157_v9 = vld [vmem:[%s1332_s7 + $0x10] sm:$0xff] }
   0x5   :  { %v46_v16 = vmul.f32 %v44_v7, %v40_v12  ;;  %v187_v2 = vpack.c.bf16 %v156_v1, %v155_v0  ;;  %v158_v10 = vld [vmem:[%s1332_s7 + $0x18] sm:$0xff]  ;;  %v160_v12 = vld [vmem:[%s1332_s7 + $0x28] sm:$0xff] }
   0x6   :  { %v45_v15 = vmul.f32 %v44_v7, %v39_v11  ;;  %v47_v17 = vmul.f32 %v44_v7, %v41_v13  ;;  %v48_v18 = vmul.f32 %v44_v7, %v42_v14  ;;  %v159_v11 = vld [vmem:[%s1332_s7 + $0x20] sm:$0xff]  ;;  %v188_v13 = vpack.c.bf16 %v158_v10, %v157_v9 }
   0x7   :  { %v51_v20 = vsel %vm49_vm1, %v46_v16, -inf  ;;  %826 = vmatprep.mubr.msk.bf16.mxu1 %vm212_vm2, %v187_v2  ;;  %v189_v14 = vpack.c.bf16 %v160_v12, %v159_v11 }
   0x8   :  { %v50_v19 = vsel %vm49_vm1, %v45_v15, -inf  ;;  %v52_v21 = vsel %vm49_vm1, %v47_v17, -inf  ;;  %v53_v22 = vsel %vm49_vm1, %v48_v18, -inf }
   0x9   :  { %v54_v23 = vmax.f32 %v50_v19, %v51_v20  ;;  %v55_v24 = vmax.f32 %v52_v21, %v53_v22  ;;  %v165_v21 = vld [vmem:[%s1332_s7 + $0x50] sm:$0xff]  ;;  %v166_v22 = vld [vmem:[%s1332_s7 + $0x58] sm:$0xff] }
   0xb   :  { %v56_v25 = vmax.f32 %v54_v23, %v55_v24  ;;  %v167_v23 = vld [vmem:[%s1332_s7 + $0x60] sm:$0xff]  ;;  %v168_v24 = vld [vmem:[%s1332_s7 + $0x68] sm:$0xff] }
   0xd   :  { %v57_v26 = vrot.slane %v56_v25, 4 }
   0xf   :  { %v58_v27 = vmax.f32 %v56_v25, %v57_v26  ;;  %v192_v25 = vpack.c.bf16 %v166_v22, %v165_v21  ;;  %v193_v26 = vpack.c.bf16 %v168_v24, %v167_v23 }
  0x11   :  { %v59_v28 = vrot.slane %v58_v27, 2 }
  0x13   :  { %v60_v29 = vmax.f32 %v58_v27, %v59_v28  ;;  %v169_v27 = vld [vmem:[%s1332_s7 + $0x70] sm:$0xff]  ;;  %v170_v28 = vld [vmem:[%s1332_s7 + $0x78] sm:$0xff] }
  0x15   :  { %v61_v30 = vrot.slane %v60_v29, 1 }
  0x17   :  { %v62_v31 = vmax.f32 %v60_v29, %v61_v30  ;;  %v171_v29 = vld [vmem:[%s1332_s7 + $0x80] sm:$0xff]  ;;  %v172_v30 = vld [vmem:[%s1332_s7 + $0x88] sm:$0xff] }
  0x19   :  { %v63_v32 = vsub.f32 %v45_v15, %v62_v31  ;;  %v64_v33 = vsub.f32 %v46_v16, %v62_v31  ;;  %v65_v34 = vsub.f32 %v47_v17, %v62_v31  ;;  %v66_v35 = vsub.f32 %v48_v18, %v62_v31  ;;  %v161_v15 = vld [vmem:[%s1332_s7 + $0x30] sm:$0xff]  ;;  %v162_v16 = vld [vmem:[%s1332_s7 + $0x38] sm:$0xff]  ;;  %v163_v17 = vld [vmem:[%s1332_s7 + $0x40] sm:$0xff] }
  0x1a   :  { %v164_v18 = vld [vmem:[%s1332_s7 + $0x48] sm:$0xff]  ;;  %v190_v19 = vpack.c.bf16 %v162_v16, %v161_v15  ;;  %v194_v31 = vpack.c.bf16 %v170_v28, %v169_v27 }
  0x1b   :  { %v67_v36 = vmul.f32 1.442695, %v63_v32  ;;  %v69_v37 = vmul.f32 1.442695, %v64_v33  ;;  %v71_v38 = vmul.f32 1.442695, %v65_v34  ;;  %v191_v20 = vpack.c.bf16 %v164_v18, %v163_v17 }
  0x1c   :  { %v73_v39 = vmul.f32 1.442695, %v66_v35  ;;  %v195_v32 = vpack.c.bf16 %v172_v30, %v171_v29  ;;  %v173_v33 = vld [vmem:[%s1332_s7 + $0x90] sm:$0xff]  ;;  %v174_v34 = vld [vmem:[%s1332_s7 + $0x98] sm:$0xff]  ;;  %v175_v35 = vld [vmem:[%s1332_s7 + $0xa0] sm:$0xff] }
  0x1d   :  { %897 = vpow2.f32 %v67_v36  ;;  %v176_v36 = vld [vmem:[%s1332_s7 + $0xa8] sm:$0xff] }
  0x1e   :  { %899 = vpow2.f32 %v69_v37  ;;  %v196_v37 = vpack.c.bf16 %v174_v34, %v173_v33 }
  0x1f   :  { %901 = vpow2.f32 %v71_v38  ;;  %v197_v38 = vpack.c.bf16 %v176_v36, %v175_v35 }
  0x20   :  { %903 = vpow2.f32 %v73_v39  ;;  %v177_v39 = vld [vmem:[%s1332_s7 + $0xb0] sm:$0xff] }
  0x2a   :  { %v898_v40 = vpop.eup %897 }
  0x2b   :  { %v900_v41 = vpop.eup %899  ;;  %v75_v42 = vsel %vm49_vm1, %v898_v40, 0.0 }
  0x2c   :  { %v902_v43 = vpop.eup %901  ;;  %v76_v44 = vsel %vm49_vm1, %v900_v41, 0.0 }
  0x2d   :  { %v904_v45 = vpop.eup %903  ;;  %v77_v46 = vadd.f32 %v76_v44, %v75_v42  ;;  %v78_v47 = vsel %vm49_vm1, %v902_v43, 0.0  ;;  %v180_v42 = vld [vmem:[%s1332_s7 + $0xc8] sm:$0xff] }
  0x2e   :  { %v80_v48 = vsel %vm49_vm1, %v904_v45, 0.0 }
  0x2f   :  { %v79_v49 = vadd.f32 %v78_v47, %v77_v46  ;;  %v182_v46 = vld [vmem:[%s1332_s7 + $0xd8] sm:$0xff]  ;;  %v183_v47 = vld [vmem:[%s1332_s7 + $0xe0] sm:$0xff] }
  0x31   :  { %v81_v50 = vadd.f32 %v80_v48, %v79_v49  ;;  %v184_v48 = vld [vmem:[%s1332_s7 + $0xe8] sm:$0xff] }
  0x33   :  { %v82_v51 = vrot.slane %v81_v50, 4 }
  0x35   :  { %v83_v52 = vadd.f32 %v82_v51, %v81_v50  ;;  %v201_v50 = vpack.c.bf16 %v184_v48, %v183_v47  ;;  %v185_v51 = vld [vmem:[%s1332_s7 + $0xf0] sm:$0xff] }
  0x37   :  { %v84_v53 = vrot.slane %v83_v52, 2 }
  0x39   :  { %v85_v54 = vadd.f32 %v84_v53, %v83_v52  ;;  %v186_v52 = vld [vmem:[%s1332_s7 + $0xf8] sm:$0xff] }
  0x3a   :  { %v202_v53 = vpack.c.bf16 %v186_v52, %v185_v51 }
  0x3b   :  { %v86_v55 = vrot.slane %v85_v54, 1 }
  0x3d   :  { %v87_v56 = vadd.f32 %v86_v55, %v85_v54  ;;  %v895_v54 = vld [vmem:[%s1333_s5 + $0x8] sm:$0xff]   ;;  %v896_v55 = vld [vmem:[%s1333_s5] sm:$0xff]  }
  0x3e   :  { %858 = vmatprep.subr.bf16.mxu0 %v895_v54 }
  0x3f   :  { %905 = vrcp.f32 %v87_v56 }
  0x4c   :  { %v906_v57 = vpop.eup %905 }
  0x4d   :  { %v89_v58 = vmul.f32 %v906_v57, %v898_v40  ;;  %v90_v59 = vmul.f32 %v906_v57, %v900_v41  ;;  %v91_v60 = vmul.f32 %v906_v57, %v902_v43  ;;  %v92_v61 = vmul.f32 %v906_v57, %v904_v45  ;;  %v178_v40 = vld [vmem:[%s1332_s7 + $0xb8] sm:$0xff]  ;;  %v179_v41 = vld [vmem:[%s1332_s7 + $0xc0] sm:$0xff]  ;;  %v181_v45 = vld [vmem:[%s1332_s7 + $0xd0] sm:$0xff] }
  0x4e   :  { %v198_v43 = vpack.c.bf16 %v178_v40, %v177_v39  ;;  %v199_v44 = vpack.c.bf16 %v180_v42, %v179_v41  ;;  %v200_v49 = vpack.c.bf16 %v182_v46, %v181_v45 }
  0x4f   :  { %v93_v62 = vpack.c.bf16 %v90_v59, %v89_v58  ;;  %v94_v63 = vpack.c.bf16 %v92_v61, %v91_v60  ;;  %v1113_v58 = vld [vmem:[%s1334_s4] ss:$0 sm:$0xff] }
  0x51   :  { %818 = vmatprep.mubr.msk.bf16.mxu0 %vm49_vm1, %v93_v62 }
  0x52   :  { %819 = vmatmul.mubr.msk.bf16.vlgmr.msra.gmra.mxu0 %vm49_vm1, %v94_v63 }
  0x53   :  { %859 = vmatpush3.bf16.msra.mxu0 %v895_v54 }
  0x54   :  { %860 = vmatprep.subr.bf16.mxu0 %v896_v55 }
  0x57   :  { %861 = vmatpush3.bf16.msra.mxu0 %v896_v55 }
 0x112   :  { %v820_v3 = vpop.f32.mrf.mxu0 }
 0x114   :  { %v140_v4 = vpop.f32.mrf.mxu0 }
 0x116   :  { %v821_v5 = vpop.f32.mrf.mxu0 }
 0x117   :  { %v204_v6 = vpack.c.bf16 %v821_v5, %v820_v3 }
 0x118   :  { %v143_v7 = vpop.f32.mrf.mxu0 }
 0x119   :  { %v203_v8 = vpack.c.bf16 %v143_v7, %v140_v4  ;;  %822 = vmatprep.subr.bf16.mxu1 %v204_v6 }
 0x11a   :  { %823 = vmatpush3.bf16.msra.mxu1 %v204_v6 }
 0x11b   :  { %824 = vmatprep.subr.bf16.mxu1 %v203_v8 }
 0x11e   :  { %825 = vmatpush3.bf16.msra.mxu1 %v203_v8 }
 0x121   :  { %827 = vmatmul.mubr.msk.bf16.vlgmr.msra.gmra.mxu1 %vm212_vm2, %v188_v13 }
 0x122   :  { %830 = vmatprep.mubr.msk.bf16.mxu1 %vm212_vm2, %v189_v14 }
 0x129   :  { %831 = vmatmul.mubr.msk.bf16.gmra.mxu1 %vm212_vm2, %v190_v19 }
 0x12a   :  { %834 = vmatprep.mubr.msk.bf16.mxu1 %vm212_vm2, %v191_v20 }
 0x131   :  { %835 = vmatmul.mubr.msk.bf16.gmra.mxu1 %vm212_vm2, %v192_v25 }
 0x132   :  { %838 = vmatprep.mubr.msk.bf16.mxu1 %vm212_vm2, %v193_v26 }
 0x139   :  { %839 = vmatmul.mubr.msk.bf16.gmra.mxu1 %vm212_vm2, %v194_v31 }
 0x13a   :  { %842 = vmatprep.mubr.msk.bf16.mxu1 %vm212_vm2, %v195_v32 }
 0x141   :  { %843 = vmatmul.mubr.msk.bf16.gmra.mxu1 %vm212_vm2, %v196_v37 }
 0x142   :  { %846 = vmatprep.mubr.msk.bf16.mxu1 %vm212_vm2, %v197_v38 }
 0x149   :  { %847 = vmatmul.mubr.msk.bf16.gmra.mxu1 %vm212_vm2, %v198_v43 }
 0x14a   :  { %850 = vmatprep.mubr.msk.bf16.mxu1 %vm212_vm2, %v199_v44 }
 0x151   :  { %851 = vmatmul.mubr.msk.bf16.gmra.mxu1 %vm212_vm2, %v200_v49 }
 0x152   :  { %854 = vmatprep.mubr.msk.bf16.mxu1 %vm212_vm2, %v201_v50 }
 0x159   :  { %855 = vmatmul.mubr.msk.bf16.gmra.mxu1 %vm212_vm2, %v202_v53 }
 0x1e1   :  { %v828_v56 = vpop.f32.mrf.mxu1 }
 0x1e2   :  { %v304_v62 = vadd.f32 %v828_v56, %v1113_v58 }
 0x1e3   :  { %v295_v57 = vpop.f32.mrf.mxu1 }
 0x1e4   :  { %v296_v60 = vadd.f32 %v1113_v58, %v295_v57  ;;  %v424_v5 = vmax.f32 %v304_v62, 0.0 }
 0x1e5   :  { %v829_v59 = vpop.f32.mrf.mxu1 }
 0x1e6   :  { %v307_v61 = vadd.f32 %v829_v59, %v1113_v58  ;;  %v422_v3 = vmax.f32 %v296_v60, 0.0 }
 0x1e7   :  { %v298_v63 = vpop.f32.mrf.mxu1 }
 0x1e8   :  { %v299_v0 = vadd.f32 %v1113_v58, %v298_v63  ;;  %v425_v1 = vmax.f32 %v307_v61, 0.0 }
 0x1e9   :  { %v832_v2 = vpop.f32.mrf.mxu1 }
 0x1ea   :  { %v423_v4 = vmax.f32 %v299_v0, 0.0  ;;  %v455_v8 = vpack.c.bf16 %v425_v1, %v424_v5  ;;  %v320_v12 = vadd.f32 %v832_v2, %v1113_v58 }
 0x1eb   :  { %v311_v6 = vpop.f32.mrf.mxu1 }
 0x1ec   :  { %v454_v7 = vpack.c.bf16 %v423_v4, %v422_v3  ;;  %v312_v10 = vadd.f32 %v1113_v58, %v311_v6  ;;  %v428_v19 = vmax.f32 %v320_v12, 0.0 }
 0x1ed   :  { %v833_v9 = vpop.f32.mrf.mxu1 }
 0x1ee   :  { %v323_v11 = vadd.f32 %v833_v9, %v1113_v58  ;;  %862 = vmatprep.mubr.msk.bf16.mxu0 %vm212_vm2, %v454_v7  ;;  %v426_v17 = vmax.f32 %v312_v10, 0.0 }
 0x1ef   :  { %v314_v13 = vpop.f32.mrf.mxu1  ;;  %863 = vmatmul.mubr.msk.bf16.vlgmr.msra.gmra.mxu0 %vm212_vm2, %v455_v8 }
 0x1f0   :  { %v315_v14 = vadd.f32 %v1113_v58, %v314_v13  ;;  %v429_v15 = vmax.f32 %v323_v11, 0.0 }
 0x1f1   :  { %v836_v16 = vpop.f32.mrf.mxu1 }
 0x1f2   :  { %v427_v18 = vmax.f32 %v315_v14, 0.0  ;;  %v457_v22 = vpack.c.bf16 %v429_v15, %v428_v19  ;;  %v336_v26 = vadd.f32 %v836_v16, %v1113_v58 }
 0x1f3   :  { %v327_v20 = vpop.f32.mrf.mxu1 }
 0x1f4   :  { %v456_v21 = vpack.c.bf16 %v427_v18, %v426_v17  ;;  %v328_v24 = vadd.f32 %v1113_v58, %v327_v20  ;;  %v432_v33 = vmax.f32 %v336_v26, 0.0 }
 0x1f5   :  { %v837_v23 = vpop.f32.mrf.mxu1 }
 0x1f6   :  { %v339_v25 = vadd.f32 %v837_v23, %v1113_v58  ;;  %866 = vmatprep.mubr.msk.bf16.mxu0 %vm212_vm2, %v456_v21  ;;  %v430_v31 = vmax.f32 %v328_v24, 0.0 }
 0x1f7   :  { %v330_v27 = vpop.f32.mrf.mxu1  ;;  %867 = vmatmul.mubr.msk.bf16.gmra.mxu0 %vm212_vm2, %v457_v22 }
 0x1f8   :  { %v331_v28 = vadd.f32 %v1113_v58, %v330_v27  ;;  %v433_v29 = vmax.f32 %v339_v25, 0.0 }
 0x1f9   :  { %v840_v30 = vpop.f32.mrf.mxu1 }
 0x1fa   :  { %v431_v32 = vmax.f32 %v331_v28, 0.0  ;;  %v459_v36 = vpack.c.bf16 %v433_v29, %v432_v33  ;;  %v352_v40 = vadd.f32 %v840_v30, %v1113_v58 }
 0x1fb   :  { %v343_v34 = vpop.f32.mrf.mxu1 }
 0x1fc   :  { %v458_v35 = vpack.c.bf16 %v431_v32, %v430_v31  ;;  %v344_v38 = vadd.f32 %v1113_v58, %v343_v34  ;;  %v436_v47 = vmax.f32 %v352_v40, 0.0 }
 0x1fd   :  { %v841_v37 = vpop.f32.mrf.mxu1 }
 0x1fe   :  { %v355_v39 = vadd.f32 %v841_v37, %v1113_v58  ;;  %870 = vmatprep.mubr.msk.bf16.mxu0 %vm212_vm2, %v458_v35  ;;  %v434_v45 = vmax.f32 %v344_v38, 0.0 }
 0x1ff   :  { %v346_v41 = vpop.f32.mrf.mxu1  ;;  %871 = vmatmul.mubr.msk.bf16.gmra.mxu0 %vm212_vm2, %v459_v36 }
 0x200   :  { %v347_v42 = vadd.f32 %v1113_v58, %v346_v41  ;;  %v437_v43 = vmax.f32 %v355_v39, 0.0 }
 0x201   :  { %v844_v44 = vpop.f32.mrf.mxu1 }
 0x202   :  { %v435_v46 = vmax.f32 %v347_v42, 0.0  ;;  %v461_v50 = vpack.c.bf16 %v437_v43, %v436_v47  ;;  %v368_v54 = vadd.f32 %v844_v44, %v1113_v58  ;;  %v1166_v42 = vld [vmem:[%s1335_s6] ss:$0 sm:$0xff] }
 0x203   :  { %v359_v48 = vpop.f32.mrf.mxu1 }
 0x204   :  { %v460_v49 = vpack.c.bf16 %v435_v46, %v434_v45  ;;  %v360_v52 = vadd.f32 %v1113_v58, %v359_v48  ;;  %v440_v62 = vmax.f32 %v368_v54, 0.0 }
 0x205   :  { %v845_v51 = vpop.f32.mrf.mxu1 }
 0x206   :  { %v371_v53 = vadd.f32 %v845_v51, %v1113_v58  ;;  %874 = vmatprep.mubr.msk.bf16.mxu0 %vm212_vm2, %v460_v49  ;;  %v438_v60 = vmax.f32 %v360_v52, 0.0 }
 0x207   :  { %v362_v55 = vpop.f32.mrf.mxu1  ;;  %875 = vmatmul.mubr.msk.bf16.gmra.mxu0 %vm212_vm2, %v461_v50 }
 0x208   :  { %v363_v56 = vadd.f32 %v1113_v58, %v362_v55  ;;  %v441_v57 = vmax.f32 %v371_v53, 0.0 }
 0x209   :  { %v848_v59 = vpop.f32.mrf.mxu1 }
 0x20a   :  { %v439_v61 = vmax.f32 %v363_v56, 0.0  ;;  %v463_v1 = vpack.c.bf16 %v441_v57, %v440_v62  ;;  %v384_v5 = vadd.f32 %v848_v59, %v1113_v58 }
 0x20b   :  { %v375_v63 = vpop.f32.mrf.mxu1 }
 0x20c   :  { %v462_v0 = vpack.c.bf16 %v439_v61, %v438_v60  ;;  %v376_v3 = vadd.f32 %v1113_v58, %v375_v63  ;;  %v444_v12 = vmax.f32 %v384_v5, 0.0 }
 0x20d   :  { %v849_v2 = vpop.f32.mrf.mxu1 }
 0x20e   :  { %v387_v4 = vadd.f32 %v849_v2, %v1113_v58  ;;  %878 = vmatprep.mubr.msk.bf16.mxu0 %vm212_vm2, %v462_v0  ;;  %v442_v10 = vmax.f32 %v376_v3, 0.0 }
 0x20f   :  { %v378_v6 = vpop.f32.mrf.mxu1  ;;  %879 = vmatmul.mubr.msk.bf16.gmra.mxu0 %vm212_vm2, %v463_v1 }
 0x210   :  { %v379_v7 = vadd.f32 %v1113_v58, %v378_v6  ;;  %v445_v8 = vmax.f32 %v387_v4, 0.0 }
 0x211   :  { %v852_v9 = vpop.f32.mrf.mxu1 }
 0x212   :  { %v443_v11 = vmax.f32 %v379_v7, 0.0  ;;  %v465_v15 = vpack.c.bf16 %v445_v8, %v444_v12  ;;  %v400_v19 = vadd.f32 %v852_v9, %v1113_v58 }
 0x213   :  { %v391_v13 = vpop.f32.mrf.mxu1 }
 0x214   :  { %v464_v14 = vpack.c.bf16 %v443_v11, %v442_v10  ;;  %v392_v17 = vadd.f32 %v1113_v58, %v391_v13  ;;  %v448_v26 = vmax.f32 %v400_v19, 0.0 }
 0x215   :  { %v853_v16 = vpop.f32.mrf.mxu1 }
 0x216   :  { %v403_v18 = vadd.f32 %v853_v16, %v1113_v58  ;;  %882 = vmatprep.mubr.msk.bf16.mxu0 %vm212_vm2, %v464_v14  ;;  %v446_v24 = vmax.f32 %v392_v17, 0.0 }
 0x217   :  { %v394_v20 = vpop.f32.mrf.mxu1  ;;  %883 = vmatmul.mubr.msk.bf16.gmra.mxu0 %vm212_vm2, %v465_v15 }
 0x218   :  { %v395_v21 = vadd.f32 %v1113_v58, %v394_v20  ;;  %v449_v22 = vmax.f32 %v403_v18, 0.0 }
 0x219   :  { %v856_v23 = vpop.f32.mrf.mxu1 }
 0x21a   :  { %v447_v25 = vmax.f32 %v395_v21, 0.0  ;;  %v467_v29 = vpack.c.bf16 %v449_v22, %v448_v26  ;;  %v416_v33 = vadd.f32 %v856_v23, %v1113_v58 }
 0x21b   :  { %v407_v27 = vpop.f32.mrf.mxu1 }
 0x21c   :  { %v466_v28 = vpack.c.bf16 %v447_v25, %v446_v24  ;;  %v408_v31 = vadd.f32 %v1113_v58, %v407_v27  ;;  %v452_v39 = vmax.f32 %v416_v33, 0.0 }
 0x21d   :  { %v857_v30 = vpop.f32.mrf.mxu1 }
 0x21e   :  { %v419_v32 = vadd.f32 %v857_v30, %v1113_v58  ;;  %886 = vmatprep.mubr.msk.bf16.mxu0 %vm212_vm2, %v466_v28  ;;  %v450_v37 = vmax.f32 %v408_v31, 0.0 }
 0x21f   :  { %v410_v34 = vpop.f32.mrf.mxu1  ;;  %887 = vmatmul.mubr.msk.bf16.gmra.mxu0 %vm212_vm2, %v467_v29 }
 0x220   :  { %v411_v35 = vadd.f32 %v1113_v58, %v410_v34  ;;  %v453_v36 = vmax.f32 %v419_v32, 0.0 }
 0x222   :  { %v451_v38 = vmax.f32 %v411_v35, 0.0  ;;  %v469_v41 = vpack.c.bf16 %v453_v36, %v452_v39 }
 0x224   :  { %v468_v40 = vpack.c.bf16 %v451_v38, %v450_v37 }
 0x226   :  { %890 = vmatprep.mubr.msk.bf16.mxu0 %vm212_vm2, %v468_v40 }
 0x227   :  { %891 = vmatmul.mubr.msk.bf16.gmra.mxu0 %vm212_vm2, %v469_v41 }
 0x2af   :  { %v864_v43 = vpop.f32.mrf.mxu0 }
 0x2b0   :  { %v584_v44 = vadd.f32 %v864_v43, %v1166_v42 }
 0x2b1   :  { %v575_v58 = vpop.f32.mrf.mxu0 }
 0x2b2   :  { %705 = vst.msk [vmem:[%s1336_s8 + $0x10] sm:$0xff] %vm702_vm3, %v584_v44  ;;  %v576_v45 = vadd.f32 %v1166_v42, %v575_v58 }
 0x2b3   :  { %v865_v46 = vpop.f32.mrf.mxu0 }
 0x2b4   :  { %703 = vst.msk [vmem:[%s1336_s8] sm:$0xff] %vm702_vm3, %v576_v45  ;;  %v587_v47 = vadd.f32 %v865_v46, %v1166_v42 }
 0x2b5   :  { %v578_v48 = vpop.f32.mrf.mxu0 }
 0x2b6   :  { %706 = vst.msk [vmem:[%s1336_s8 + $0x18] sm:$0xff] %vm702_vm3, %v587_v47  ;;  %v579_v49 = vadd.f32 %v1166_v42, %v578_v48 }
 0x2b7   :  { %v868_v50 = vpop.f32.mrf.mxu0 }
 0x2b8   :  { %704 = vst.msk [vmem:[%s1336_s8 + $0x8] sm:$0xff] %vm702_vm3, %v579_v49  ;;  %v600_v51 = vadd.f32 %v868_v50, %v1166_v42 }
 0x2b9   :  { %v591_v52 = vpop.f32.mrf.mxu0 }
 0x2ba   :  { %709 = vst.msk [vmem:[%s1336_s8 + $0x30] sm:$0xff] %vm702_vm3, %v600_v51  ;;  %v592_v53 = vadd.f32 %v1166_v42, %v591_v52 }
 0x2bb   :  { %v869_v54 = vpop.f32.mrf.mxu0 }
 0x2bc   :  { %707 = vst.msk [vmem:[%s1336_s8 + $0x20] sm:$0xff] %vm702_vm3, %v592_v53  ;;  %v603_v55 = vadd.f32 %v869_v54, %v1166_v42 }
 0x2bd   :  { %v594_v56 = vpop.f32.mrf.mxu0 }
 0x2be   :  { %710 = vst.msk [vmem:[%s1336_s8 + $0x38] sm:$0xff] %vm702_vm3, %v603_v55  ;;  %v595_v57 = vadd.f32 %v1166_v42, %v594_v56 }
 0x2bf   :  { %v872_v59 = vpop.f32.mrf.mxu0 }
 0x2c0   :  { %708 = vst.msk [vmem:[%s1336_s8 + $0x28] sm:$0xff] %vm702_vm3, %v595_v57  ;;  %v616_v60 = vadd.f32 %v872_v59, %v1166_v42 }
 0x2c1   :  { %v607_v61 = vpop.f32.mrf.mxu0 }
 0x2c2   :  { %713 = vst.msk [vmem:[%s1336_s8 + $0x50] sm:$0xff] %vm702_vm3, %v616_v60  ;;  %v608_v62 = vadd.f32 %v1166_v42, %v607_v61 }
 0x2c3   :  { %v873_v63 = vpop.f32.mrf.mxu0 }
 0x2c4   :  { %711 = vst.msk [vmem:[%s1336_s8 + $0x40] sm:$0xff] %vm702_vm3, %v608_v62  ;;  %v619_v0 = vadd.f32 %v873_v63, %v1166_v42 }
 0x2c5   :  { %v610_v1 = vpop.f32.mrf.mxu0 }
 0x2c6   :  { %714 = vst.msk [vmem:[%s1336_s8 + $0x58] sm:$0xff] %vm702_vm3, %v619_v0  ;;  %v611_v2 = vadd.f32 %v1166_v42, %v610_v1 }
 0x2c7   :  { %v876_v3 = vpop.f32.mrf.mxu0 }
 0x2c8   :  { %712 = vst.msk [vmem:[%s1336_s8 + $0x48] sm:$0xff] %vm702_vm3, %v611_v2  ;;  %v632_v4 = vadd.f32 %v876_v3, %v1166_v42 }
 0x2c9   :  { %v623_v5 = vpop.f32.mrf.mxu0 }
 0x2ca   :  { %717 = vst.msk [vmem:[%s1336_s8 + $0x70] sm:$0xff] %vm702_vm3, %v632_v4  ;;  %v624_v6 = vadd.f32 %v1166_v42, %v623_v5 }
 0x2cb   :  { %v877_v7 = vpop.f32.mrf.mxu0 }
 0x2cc   :  { %715 = vst.msk [vmem:[%s1336_s8 + $0x60] sm:$0xff] %vm702_vm3, %v624_v6  ;;  %v635_v8 = vadd.f32 %v877_v7, %v1166_v42 }
 0x2cd   :  { %v626_v9 = vpop.f32.mrf.mxu0 }
 0x2ce   :  { %718 = vst.msk [vmem:[%s1336_s8 + $0x78] sm:$0xff] %vm702_vm3, %v635_v8  ;;  %v627_v10 = vadd.f32 %v1166_v42, %v626_v9 }
 0x2cf   :  { %v880_v11 = vpop.f32.mrf.mxu0 }
 0x2d0   :  { %716 = vst.msk [vmem:[%s1336_s8 + $0x68] sm:$0xff] %vm702_vm3, %v627_v10  ;;  %v648_v12 = vadd.f32 %v880_v11, %v1166_v42 }
 0x2d1   :  { %v639_v13 = vpop.f32.mrf.mxu0 }
 0x2d2   :  { %721 = vst.msk [vmem:[%s1336_s8 + $0x90] sm:$0xff] %vm702_vm3, %v648_v12  ;;  %v640_v14 = vadd.f32 %v1166_v42, %v639_v13 }
 0x2d3   :  { %v881_v15 = vpop.f32.mrf.mxu0 }
 0x2d4   :  { %719 = vst.msk [vmem:[%s1336_s8 + $0x80] sm:$0xff] %vm702_vm3, %v640_v14  ;;  %v651_v16 = vadd.f32 %v881_v15, %v1166_v42 }
 0x2d5   :  { %v642_v17 = vpop.f32.mrf.mxu0 }
 0x2d6   :  { %722 = vst.msk [vmem:[%s1336_s8 + $0x98] sm:$0xff] %vm702_vm3, %v651_v16  ;;  %v643_v18 = vadd.f32 %v1166_v42, %v642_v17 }
 0x2d7   :  { %v884_v19 = vpop.f32.mrf.mxu0 }
 0x2d8   :  { %720 = vst.msk [vmem:[%s1336_s8 + $0x88] sm:$0xff] %vm702_vm3, %v643_v18  ;;  %v664_v20 = vadd.f32 %v884_v19, %v1166_v42 }
 0x2d9   :  { %v655_v21 = vpop.f32.mrf.mxu0 }
 0x2da   :  { %725 = vst.msk [vmem:[%s1336_s8 + $0xb0] sm:$0xff] %vm702_vm3, %v664_v20  ;;  %v656_v22 = vadd.f32 %v1166_v42, %v655_v21 }
 0x2db   :  { %v885_v23 = vpop.f32.mrf.mxu0 }
 0x2dc   :  { %723 = vst.msk [vmem:[%s1336_s8 + $0xa0] sm:$0xff] %vm702_vm3, %v656_v22  ;;  %v667_v24 = vadd.f32 %v885_v23, %v1166_v42 }
 0x2dd   :  { %v658_v25 = vpop.f32.mrf.mxu0 }
 0x2de   :  { %726 = vst.msk [vmem:[%s1336_s8 + $0xb8] sm:$0xff] %vm702_vm3, %v667_v24  ;;  %v659_v26 = vadd.f32 %v1166_v42, %v658_v25 }
 0x2df   :  { %v888_v27 = vpop.f32.mrf.mxu0 }
 0x2e0   :  { %724 = vst.msk [vmem:[%s1336_s8 + $0xa8] sm:$0xff] %vm702_vm3, %v659_v26  ;;  %v680_v28 = vadd.f32 %v888_v27, %v1166_v42 }
 0x2e1   :  { %v671_v29 = vpop.f32.mrf.mxu0 }
 0x2e2   :  { %729 = vst.msk [vmem:[%s1336_s8 + $0xd0] sm:$0xff] %vm702_vm3, %v680_v28  ;;  %v672_v30 = vadd.f32 %v1166_v42, %v671_v29 }
 0x2e3   :  { %v889_v31 = vpop.f32.mrf.mxu0 }
 0x2e4   :  { %727 = vst.msk [vmem:[%s1336_s8 + $0xc0] sm:$0xff] %vm702_vm3, %v672_v30  ;;  %v683_v32 = vadd.f32 %v889_v31, %v1166_v42 }
 0x2e5   :  { %v674_v33 = vpop.f32.mrf.mxu0 }
 0x2e6   :  { %730 = vst.msk [vmem:[%s1336_s8 + $0xd8] sm:$0xff] %vm702_vm3, %v683_v32  ;;  %v675_v34 = vadd.f32 %v1166_v42, %v674_v33 }
 0x2e7   :  { %v892_v35 = vpop.f32.mrf.mxu0 }
 0x2e8   :  { %728 = vst.msk [vmem:[%s1336_s8 + $0xc8] sm:$0xff] %vm702_vm3, %v675_v34  ;;  %v696_v36 = vadd.f32 %v892_v35, %v1166_v42 }
 0x2e9   :  { %v687_v37 = vpop.f32.mrf.mxu0 }
 0x2ea   :  { %733 = vst.msk [vmem:[%s1336_s8 + $0xf0] sm:$0xff] %vm702_vm3, %v696_v36  ;;  %v688_v38 = vadd.f32 %v1166_v42, %v687_v37 }
 0x2eb   :  { %v893_v39 = vpop.f32.mrf.mxu0 }
 0x2ec   :  { %731 = vst.msk [vmem:[%s1336_s8 + $0xe0] sm:$0xff] %vm702_vm3, %v688_v38  ;;  %v699_v40 = vadd.f32 %v893_v39, %v1166_v42 }
 0x2ed   :  { %v690_v41 = vpop.f32.mrf.mxu0 }
 0x2ee   :  { %734 = vst.msk [vmem:[%s1336_s8 + $0xf8] sm:$0xff] %vm702_vm3, %v699_v40  ;;  %v691_v43 = vadd.f32 %v1166_v42, %v690_v41 }
 0x2f0   :  { %732 = vst.msk [vmem:[%s1336_s8 + $0xe8] sm:$0xff] %vm702_vm3, %v691_v43 }

</bundles_post_ra>
